<compile_context>
chip_gen: v6e
topology: v6e:2x2x1
jax: 0.10.0
libtpu: 0.0.40
codegen_flags: <defaults>
</compile_context>

<pallas_src>
import jax
import jax.numpy as jnp
import numpy as np
from jax.experimental import pallas as pl
from jax.experimental.pallas import tpu as pltpu

MAX_TILE_B = 4096   # batch-tile cap: ~1.5 MiB VMEM/step, fine on v5e/v6e/v7x defaults
FEAT_DIM = 14       # hand-crafted feature width fixed by the module
OUT_DIM = 2         # Subtask A logits (OFF, NOT)


def _round_up(x, m):
    return ((x + m - 1) // m) * m


def _pick_batch_tile(b, max_tile=MAX_TILE_B):
    """Batch tile: multiple of 8 (sublane), as large as possible to amortize the
    ~0.35 us/grid-step overhead, but keep >= 2 grid steps when B allows so a
    'parallel' grid can be sharded across v7x's two TensorCores."""
    b8 = _round_up(b, 8)
    if b8 <= 8:
        return 8
    tile = _round_up(pl.cdiv(b8, 2), 8)
    return min(tile, max_tile)


# ---------------------------------------------------------------------------
# Pallas kernel: two batch-tiled MXU dots on the folded affine map + bias.
# ---------------------------------------------------------------------------
def folded_mlp_kernel(emb_ref, feat_ref, a_ref, bf_ref, c_ref, out_ref):
    # emb_ref : [tile_b, E]   mean word embeddings (batch tile)
    # feat_ref: [tile_b, F]   hand-crafted features (batch tile)
    # a_ref   : [E, 2]        folded embedding-branch weights (resident)
    # bf_ref  : [F, 2]        folded feature-branch weights   (resident)
    # c_ref   : [1, 2]        folded bias                     (resident)
    # out_ref : [tile_b, 2]   compact output (2 == full last dim)
    acc = jnp.dot(emb_ref[...], a_ref[...], preferred_element_type=jnp.float32)
    acc = acc + jnp.dot(feat_ref[...], bf_ref[...],
                        preferred_element_type=jnp.float32)
    out_ref[...] = acc + c_ref[...]


# ---------------------------------------------------------------------------
# Host-side folding of the activation-free affine chain. Call ONCE at init.
# ---------------------------------------------------------------------------
def fold_params(params):
    # embedding branch: fc1_embedding -> fc2_embedding -> fc3_embedding -> output[:H2]
    A = params["w1e"] @ params["w2e"] @ params["w3e"] @ params["wo1"]           # [E, 2]
    b_e = ((((params["b1e"] @ params["w2e"]) + params["b2e"]) @ params["w3e"])
           + params["b3e"]) @ params["wo1"]                                      # [1, 2]
    # feature branch: fc1 -> fc2 -> fc3 -> output[H2:]
    Bf = params["w1"] @ params["w2"] @ params["w3"] @ params["wo2"]              # [F, 2]
    b_f = ((((params["b1"] @ params["w2"]) + params["b2"]) @ params["w3"])
           + params["b3"]) @ params["wo2"]                                       # [1, 2]
    c = b_e + b_f + params["bo"]                                                 # [1, 2]
    return (A.astype(jnp.float32), Bf.astype(jnp.float32), c.astype(jnp.float32))


# ---------------------------------------------------------------------------
# Forward: gather+mean in XLA glue, folded affine map in the Pallas kernel.
# ---------------------------------------------------------------------------
def mlp_features_forward(tweet, features, embedding, A, Bf, c, *,
                         max_tile=MAX_TILE_B):
    # torch.mean(word_embeddings(tweet), dim=1): XLA fuses gather + reduce, the
    # [B, S, E] tensor never crosses the kernel boundary.
    # TODO(synk): jnp.take clips out-of-vocab ids instead of erroring like
    # nn.Embedding (silently uses the last embedding row for OOV tokens).
    mean_emb = jnp.mean(jnp.take(embedding, tweet, axis=0), axis=1)
    mean_emb = mean_emb.astype(jnp.float32)                                      # [B, E]
    features = features.astype(jnp.float32)                                      # [B, F]

    B = mean_emb.shape[0]
    E = A.shape[0]
    F = Bf.shape[0]
    n_out = A.shape[1]
    assert mean_emb.shape[1] == E and features.shape[1] == F
    assert Bf.shape[1] == n_out and c.shape == (1, n_out)

    tile_b = _pick_batch_tile(B, max_tile)
    b_pad = _round_up(B, tile_b)
    if b_pad != B:
        mean_emb = jnp.pad(mean_emb, ((0, b_pad - B), (0, 0)))
        features = jnp.pad(features, ((0, b_pad - B), (0, 0)))

    out_padded = pl.pallas_call(
        folded_mlp_kernel,
        out_shape=jax.ShapeDtypeStruct((b_pad, n_out), jnp.float32),
        grid=(b_pad // tile_b,),
        in_specs=[
            pl.BlockSpec((tile_b, E), lambda i: (i, 0)),       # mean_emb tile
            pl.BlockSpec((tile_b, F), lambda i: (i, 0)),       # features tile
            pl.BlockSpec((E, n_out), lambda i: (0, 0)),        # A   (resident)
            pl.BlockSpec((F, n_out), lambda i: (0, 0)),        # Bf  (resident)
            pl.BlockSpec((1, n_out), lambda i: (0, 0)),        # c   (resident)
        ],
        out_specs=pl.BlockSpec((tile_b, n_out), lambda i: (i, 0)),
        compiler_params=pltpu.CompilerParams(
            dimension_semantics=("parallel",)),
    )(mean_emb, features, A, Bf, c)

    return out_padded[:B]


# ---------------------------------------------------------------------------
# Deterministic parameter construction (synthetic, not a checkpoint load).
# Weights stored pre-transposed to [in, out]; biases as [1, out] rows.
# ---------------------------------------------------------------------------
def make_params(key, vocab_size, embedding_dim, hidden_dim, feat_dim=FEAT_DIM):
    h2 = hidden_dim // 2
    keys = jax.random.split(key, 16)

    def lin(kw, kb, d_in, d_out):
        w = jax.random.normal(kw, (d_in, d_out), jnp.float32) * 0.05
        b = jax.random.normal(kb, (1, d_out), jnp.float32) * 0.05
        return w, b

    params = {}
    params["embedding"] = jax.random.normal(
        keys[0], (vocab_size, embedding_dim), jnp.float32)
    params["w1e"], params["b1e"] = lin(keys[1], keys[2], embedding_dim, hidden_dim)
    params["w2e"], params["b2e"] = lin(keys[3], keys[4], hidden_dim, hidden_dim)
    params["w3e"], params["b3e"] = lin(keys[5], keys[6], hidden_dim, h2)
    params["w1"], params["b1"] = lin(keys[7], keys[8], feat_dim, feat_dim)
    params["w2"], params["b2"] = lin(keys[9], keys[10], feat_dim, 6)
    params["w3"], params["b3"] = lin(keys[11], keys[12], 6, 6)
    # output layer over concat([x1(H2), x2(6)]) -> split into two weight slabs
    wo, bo = lin(keys[13], keys[14], h2 + 6, OUT_DIM)
    params["wo1"] = wo[:h2, :]
    params["wo2"] = wo[h2:, :]
    params["bo"] = bo
    return params


def reference_forward(tweet, features, params):
    """Pure-JAX reference matching the (un-folded) PyTorch forward exactly."""
    embedded = jnp.mean(jnp.take(params["embedding"], tweet, axis=0), axis=1)
    x1 = embedded @ params["w1e"] + params["b1e"]
    x1 = x1 @ params["w2e"] + params["b2e"]
    x1 = x1 @ params["w3e"] + params["b3e"]
    x2 = features @ params["w1"] + params["b1"]
    x2 = x2 @ params["w2"] + params["b2"]
    x2 = x2 @ params["w3"] + params["b3"]
    x3 = jnp.concatenate([x1, x2], axis=1)
    wo = jnp.concatenate([params["wo1"], params["wo2"]], axis=0)
    return x3 @ wo + params["bo"]


if __name__ == "__main__":
    B, S = 16, 8           # batch (exercises a 2-step "parallel" grid), seq len
    V, E = 50, 32          # vocab size, embedding dim
    H = 32                 # hidden dim (H//2 = 16)

    key = jax.random.PRNGKey(0)
    k_tweet, k_feat, k_params = jax.random.split(key, 3)

    tweet = jax.random.randint(k_tweet, (B, S), 0, V, dtype=jnp.int32)
    features = jax.random.normal(k_feat, (B, FEAT_DIM), jnp.float32)
    params = make_params(k_params, V, E, H, FEAT_DIM)

    # Fold the Linear chain ONCE at init; the hot path never re-folds.
    A, Bf, c = jax.block_until_ready(fold_params(params))

    fwd = jax.jit(mlp_features_forward)
    out = jax.block_until_ready(
        fwd(tweet, features, params["embedding"], A, Bf, c))

    ref = reference_forward(tweet, features, params)
    np.testing.assert_allclose(np.asarray(out), np.asarray(ref),
                               rtol=1e-5, atol=1e-5)
    assert out.shape == (B, OUT_DIM)
    print("KERNEL_OK")
</pallas_src>

<mosaic_0001>
module attributes {stable_mosaic.version = 11 : i64} {
  func.func @folded_mlp_kernel(%arg0: i32, %arg1: memref<8x32xf32, #tpu.memory_space<vmem>>, %arg2: memref<8x14xf32, #tpu.memory_space<vmem>>, %arg3: memref<32x2xf32, #tpu.memory_space<vmem>>, %arg4: memref<14x2xf32, #tpu.memory_space<vmem>>, %arg5: memref<1x2xf32, #tpu.memory_space<vmem>>, %arg6: memref<8x2xf32, #tpu.memory_space<vmem>>) attributes {dimension_semantics = [#tpu.dimension_semantics<parallel>], iteration_bounds = array<i64: 2>, scalar_prefetch = 0 : i64, scratch_operands = 0 : i64, tpu.core_type = #tpu.core_type<tc>, window_params = [{transform_indices = @transform_0, window_bounds = array<i64: 8, 32>}, {transform_indices = @transform_1, window_bounds = array<i64: 8, 14>}, {pipeline_mode = #tpu.pipeline_mode<synchronous>, transform_indices = @transform_2, window_bounds = array<i64: 32, 2>}, {pipeline_mode = #tpu.pipeline_mode<synchronous>, transform_indices = @transform_3, window_bounds = array<i64: 14, 2>}, {pipeline_mode = #tpu.pipeline_mode<synchronous>, transform_indices = @transform_4, window_bounds = array<i64: 1, 2>}, {transform_indices = @transform_5, window_bounds = array<i64: 8, 2>}]} {
    %c0 = arith.constant 0 : index
    %c0_0 = arith.constant 0 : index
    %0 = vector.load %arg1[%c0, %c0_0] : memref<8x32xf32, #tpu.memory_space<vmem>>, vector<8x32xf32>
    %c0_1 = arith.constant 0 : index
    %c0_2 = arith.constant 0 : index
    %1 = vector.load %arg3[%c0_1, %c0_2] : memref<32x2xf32, #tpu.memory_space<vmem>>, vector<32x2xf32>
    %cst = arith.constant dense<0.000000e+00> : vector<8x2xf32>
    %2 = tpu.matmul %0, %1, %cst {dimension_numbers = #tpu.dot_dimension_numbers<[1], [0], [0], [1], [0, 0, 1, 1], [], []>} : vector<8x32xf32>, vector<32x2xf32>, vector<8x2xf32> -> vector<8x2xf32>
    %c0_3 = arith.constant 0 : index
    %c0_4 = arith.constant 0 : index
    %3 = vector.load %arg2[%c0_3, %c0_4] : memref<8x14xf32, #tpu.memory_space<vmem>>, vector<8x14xf32>
    %c0_5 = arith.constant 0 : index
    %c0_6 = arith.constant 0 : index
    %4 = vector.load %arg4[%c0_5, %c0_6] : memref<14x2xf32, #tpu.memory_space<vmem>>, vector<14x2xf32>
    %cst_7 = arith.constant dense<0.000000e+00> : vector<8x2xf32>
    %5 = tpu.matmul %3, %4, %cst_7 {dimension_numbers = #tpu.dot_dimension_numbers<[1], [0], [0], [1], [0, 0, 1, 1], [], []>} : vector<8x14xf32>, vector<14x2xf32>, vector<8x2xf32> -> vector<8x2xf32>
    %6 = arith.addf %2, %5 : vector<8x2xf32>
    %c0_8 = arith.constant 0 : index
    %c0_9 = arith.constant 0 : index
    %7 = vector.load %arg5[%c0_8, %c0_9] : memref<1x2xf32, #tpu.memory_space<vmem>>, vector<1x2xf32>
    %8 = vector.broadcast %7 : vector<1x2xf32> to vector<8x2xf32>
    %9 = arith.addf %6, %8 : vector<8x2xf32>
    %c0_10 = arith.constant 0 : index
    %c0_11 = arith.constant 0 : index
    %10 = vector.load %arg6[%c0_10, %c0_11] : memref<8x2xf32, #tpu.memory_space<vmem>>, vector<8x2xf32>
    tpu.vector_store %arg6[%c0_10, %c0_11], %9 {strides = array<i32>} : memref<8x2xf32, #tpu.memory_space<vmem>>, vector<8x2xf32>,
    return
  }
  func.func @transform_0(%arg0: i32) -> (i32, i32) {
    %c0_i32 = arith.constant 0 : i32
    %c0_i32_0 = arith.constant 0 : i32
    return %arg0, %c0_i32 : i32, i32
  }
  func.func @transform_1(%arg0: i32) -> (i32, i32) {
    %c0_i32 = arith.constant 0 : i32
    %c0_i32_0 = arith.constant 0 : i32
    return %arg0, %c0_i32 : i32, i32
  }
  func.func @transform_2(%arg0: i32) -> (i32, i32) {
    %c0_i32 = arith.constant 0 : i32
    %c0_i32_0 = arith.constant 0 : i32
    %c0_i32_1 = arith.constant 0 : i32
    return %c0_i32, %c0_i32_0 : i32, i32
  }
  func.func @transform_3(%arg0: i32) -> (i32, i32) {
    %c0_i32 = arith.constant 0 : i32
    %c0_i32_0 = arith.constant 0 : i32
    %c0_i32_1 = arith.constant 0 : i32
    return %c0_i32, %c0_i32_0 : i32, i32
  }
  func.func @transform_4(%arg0: i32) -> (i32, i32) {
    %c0_i32 = arith.constant 0 : i32
    %c0_i32_0 = arith.constant 0 : i32
    %c0_i32_1 = arith.constant 0 : i32
    return %c0_i32, %c0_i32_0 : i32, i32
  }
  func.func @transform_5(%arg0: i32) -> (i32, i32) {
    %c0_i32 = arith.constant 0 : i32
    %c0_i32_0 = arith.constant 0 : i32
    return %arg0, %c0_i32 : i32, i32
  }
}

</mosaic_0001>

<bundles_post_ra>
// kernel: mlp_features_forward.1
= control target key start
LH: loop header
LB: loop body
LE: loop exit
PB: predicated region body
PF: predicated region fallthrough
CT: control target
= control target key end

     0   :  { %s562_s18 = smov 0   ;;  %s603_s0 = inlined_call_operand.vmem [shape: f32[16,32], index: 0, kind: input, shape index: {}]   ;;  %s604_s1 = inlined_call_operand.vmem [shape: f32[16,14], index: 1, kind: input, shape index: {}]   ;;  %s605_s2 = inlined_call_operand.vmem [shape: f32[32,2], index: 2, kind: input, shape index: {}]   ;;  %s606_s3 = inlined_call_operand.vmem [shape: f32[14,2], index: 3, kind: input, shape index: {}]   ;;  %s607_s4 = inlined_call_operand.vmem [shape: f32[1,2], index: 4, kind: input, shape index: {}]   ;;  %s608_s5 = inlined_call_operand.vmem [shape: f32[16,2], index: 5, kind: output, shape index: {}]  }
   0x1 LB: > { %s472_s19 = sadd.s32 4294967295, %s528_s18   ;;  %p476_p0 = scmp.ge.s32.totalorder %s528_s18, 1  ;;  %s528_s18 = sphi %s562_s18, %s15_s18  }
   0x2   : > { %p195_p1 = scmp.lt.s32.totalorder %s528_s18, 3 }
   0x4   : > { %p196_p2 = pnand %p476_p0, %p195_p1 }
   0x5   : > { %p225_p3 = scmp.lt.s32.totalorder (!%p196_p2), %s472_s19, 1 }
   0x6   : > { %199 = sbr.rel (%p196_p2) target bundleno = 218 (0xda), region = 40 }
   0xb   : > { %v241_v0 = vld [vmem:[%s605_s2 + $0x18] sm:$0xff]  ;;  %v244_v1 = vld [vmem:[%s606_s3 + $0x8] sm:$0x3f]  ;;  %vm249_vm0 = vcmask 1045504   ;;  %v530_v2 = vmov 0.0   ;;  %v240_v3 = vld [vmem:[%s605_s2 + $0x10] sm:$0xff] }
   0xc   : > { %501 = vmatprep.subr.mxu1 %v530_v2  ;;  %494 = vmatprep.subr.mxu0 %v530_v2  ;;  %v243_v4 = vld [vmem:[%s606_s3] sm:$0xff]  ;;  %v239_v5 = vld [vmem:[%s605_s2 + $0x8] sm:$0xff]  ;;  %s610_s19 = smov (!%p225_p3, %s472_s19), 1  ;;  %vm531_vm1 = vmmov 0   ;;  %vm245_vm2 = vcmask 113664   ;;  %vm323_vm3 = vcmask 261120  }
   0xd   : > { %502 = vmatpush3.msra.mxu1 %v241_v0  ;;  %495 = vmatpush3.msk.msra.mxu0 %vm249_vm0, %v244_v1  ;;  %s477_s30 = sshll.u32 %s610_s19, 3  ;;  %v238_v6 = vld [vmem:[%s605_s2] sm:$0xff]  ;;  %vm405_vm4 = vcmask 15360  }
   0xe   : > { %503 = vmatprep.subr.mxu1 %v530_v2  ;;  %496 = vmatprep.subr.mxu0 %v530_v2  ;;  %s232_s10 = scalar_lea.vmem %s604_s1, %s477_s30  ;;  %s228_s13 = scalar_lea.vmem %s603_s0, %s477_s30  ;;  %v483_v11 = vld [vmem:[%s607_s4] ss:$0 sm:$0xff] }
   0xf   : > { %504 = vmatpush3.msra.mxu1 %v240_v3  ;;  %497 = vmatpush3.msra.mxu0 %v243_v4  ;;  %v242_v7 = vld [vmem:[%s232_s10] sm:$0xff]  ;;  %s236_s19 = scalar_lea.vmem %s608_s5, %s477_s30 }
  0x10   : > { %505 = vmatprep.subr.mxu1 %v530_v2  ;;  %498 = vmatprep.mubr.msk.f32.mxu0 %vm531_vm1, %v530_v2  ;;  %v237_v8 = vld [vmem:[%s228_s13] sm:$0xff] }
  0x11   : > { %506 = vmatpush3.msra.mxu1 %v239_v5  ;;  %509 = vmatprep.mubr.msk.f32.mxu1 %vm531_vm1, %v530_v2 }
  0x12   : > { %507 = vmatprep.subr.mxu1 %v530_v2  ;;  %499 = vmatmul.mubr.msk.f32.vlgmr.msra.gmra.mxu0 %vm245_vm2, %v242_v7 }
  0x13   : > { %508 = vmatpush3.msra.mxu1 %v238_v6 }
  0x14   : > { %510 = vmatmul.mubr.msk.f32.vlgmr.msra.gmra.mxu1 %vm323_vm3, %v237_v8 }
  0xd2   : > { %v319_v9 = vpop.f32.mrf.mxu0 }
  0xd4   : > { %v393_v10 = vpop.f32.mrf.mxu1  ;;  %v500_v12 = vpop.f32.mrf.mxu0 }
  0xd5   : > { %v394_v13 = vadd.f32 %v393_v10, %v319_v9 }
  0xd6   : > { %v511_v14 = vpop.f32.mrf.mxu1 }
  0xd7   : > { %v404_v15 = vadd.f32 %v483_v11, %v394_v13 }
  0xd9   : > { %406 = vst.msk [vmem:[%s236_s19] sm:$0xff] %vm405_vm4, %v404_v15 }
  0xda PF: > { %s15_s18 = sadd.s32 1, %s528_s18  }
  0xdb   : > { %p12_p4 = scmp.ge.s32.totalorder %s15_s18, 4  }
  0xdd   :  { %14 = sbr.rel (!%p12_p4) target bundleno = 1 (0x1), region = 73 }

</bundles_post_ra>
